<compile_context>
chip_gen: v7x
topology: tpu7x:2x2x1
jax: 0.10.0
libtpu: 0.0.40
codegen_flags: <defaults>
</compile_context>

<pallas_src>
import functools
import time

import jax
import jax.numpy as jnp
from jax import lax
from jax.experimental import pallas as pl
from jax.experimental.pallas import tpu as pltpu

# Problem sizes (small; >=16 sensors since the original plots sensor index 15).
B, C, T, H = 2, 16, 128, 32

# Adam hyper-parameters (match the PyTorch module).
LR = 1e-4
BETA1, BETA2 = 0.9, 0.98
EPS_ADAM = 1e-8

# dot_general dimension numbers for 2-D operands.
_NT = (((1,), (1,)), ((), ()))   # contract trailing dims  (== lhs @ rhs.T)
_TN = (((0,), (0,)), ((), ()))   # contract leading dims   (== lhs.T @ rhs)

_PKEYS = ("w1t", "b1", "w2", "b2")


# ----------------------------------------------------------------------------
# Pallas kernels
# ----------------------------------------------------------------------------
def _train_step_kernel(scale_ref, x_ref, y_ref,
                       w1t_ref, b1_ref, w2_ref, b2_ref,
                       mw1_ref, mb1_ref, mw2_ref, mb2_ref,
                       vw1_ref, vb1_ref, vw2_ref, vb2_ref,
                       loss_ref,
                       ow1_ref, ob1_ref, ow2_ref, ob2_ref,
                       omw1_ref, omb1_ref, omw2_ref, omb2_ref,
                       ovw1_ref, ovb1_ref, ovw2_ref, ovb2_ref,
                       *, inv_count, beta1, beta2, eps):
    """Fused forward + MSE + backward + Adam for one batch.

    Params live in a lane-dense layout: W1 transposed as (H, T), W2 as (H, T),
    biases as (1, H) / (1, T).  Gradients never leave VMEM; the updated
    params / moments overwrite the inputs via input_output_aliases.
    MXU operands are bf16 (f32 accumulation); elementwise math stays f32.
    """
    a = scale_ref[0]    # lr / (1 - beta1**t)
    c2 = scale_ref[1]   # 1  / (1 - beta2**t)

    x = x_ref[...]
    y = y_ref[...]
    w1t = w1t_ref[...]
    b1 = b1_ref[...]
    w2 = w2_ref[...]
    b2 = b2_ref[...]

    x_bf = x.astype(jnp.bfloat16)
    w1t_bf = w1t.astype(jnp.bfloat16)
    w2_bf = w2.astype(jnp.bfloat16)

    # ---- forward ----
    h_pre = lax.dot_general(x_bf, w1t_bf, _NT,
                            preferred_element_type=jnp.float32) + b1      # (N, H)
    h = jnp.maximum(h_pre, 0.0)
    h_bf = h.astype(jnp.bfloat16)
    yhat = jnp.dot(h_bf, w2_bf, preferred_element_type=jnp.float32) + b2  # (N, T)
    diff = yhat - y
    loss = jnp.sum(diff * diff, keepdims=True) * inv_count                # (1, 1)
    loss_ref[...] = jnp.broadcast_to(loss, loss_ref.shape)  # lane-dense loss row

    # ---- backward of mean((yhat - y)^2) ----
    d_yhat = diff * (2.0 * inv_count)                                     # (N, T)
    d_yhat_bf = d_yhat.astype(jnp.bfloat16)
    dw2 = lax.dot_general(h_bf, d_yhat_bf, _TN,
                          preferred_element_type=jnp.float32)             # (H, T)
    db2 = jnp.sum(d_yhat, axis=0, keepdims=True)                          # (1, T)
    d_h = lax.dot_general(d_yhat_bf, w2_bf, _NT,
                          preferred_element_type=jnp.float32)             # (N, H)
    d_hpre = jnp.where(h_pre > 0.0, d_h, 0.0)
    dw1t = lax.dot_general(d_hpre.astype(jnp.bfloat16), x_bf, _TN,
                           preferred_element_type=jnp.float32)            # (H, T)
    db1 = jnp.sum(d_hpre, axis=0, keepdims=True)                          # (1, H)

    # ---- fused Adam (f32 elementwise), in-place via aliased outputs ----
    def adam(p, g, m, v, op_ref, om_ref, ov_ref):
        m_new = beta1 * m + (1.0 - beta1) * g
        v_new = beta2 * v + (1.0 - beta2) * (g * g)
        op_ref[...] = p - a * m_new / (jnp.sqrt(v_new * c2) + eps)
        om_ref[...] = m_new
        ov_ref[...] = v_new

    adam(w1t, dw1t, mw1_ref[...], vw1_ref[...], ow1_ref, omw1_ref, ovw1_ref)
    adam(b1,  db1,  mb1_ref[...], vb1_ref[...], ob1_ref, omb1_ref, ovb1_ref)
    adam(w2,  dw2,  mw2_ref[...], vw2_ref[...], ow2_ref, omw2_ref, ovw2_ref)
    adam(b2,  db2,  mb2_ref[...], vb2_ref[...], ob2_ref, omb2_ref, ovb2_ref)


def _eval_loss_kernel(x_ref, y_ref, w1t_ref, b1_ref, w2_ref, b2_ref, loss_ref,
                      *, inv_count):
    """Model forward fused with MSE for one eval batch (one grid step)."""
    x = x_ref[0]                                                          # (N, T)
    y = y_ref[0]
    h_pre = lax.dot_general(x.astype(jnp.bfloat16),
                            w1t_ref[...].astype(jnp.bfloat16), _NT,
                            preferred_element_type=jnp.float32) + b1_ref[...]
    h = jnp.maximum(h_pre, 0.0)
    yhat = jnp.dot(h.astype(jnp.bfloat16), w2_ref[...].astype(jnp.bfloat16),
                   preferred_element_type=jnp.float32) + b2_ref[...]
    diff = yhat - y
    loss = jnp.sum(diff * diff, keepdims=True) * inv_count                # (1, 1)
    loss_ref[...] = jnp.broadcast_to(loss, loss_ref.shape)                # (1,1,T)


# ----------------------------------------------------------------------------
# pallas_call wrappers
# ----------------------------------------------------------------------------
def _fused_step_call(scales, x2, y2, p, m, v, *, beta1, beta2, eps):
    """One fused fwd+bwd+Adam Pallas call; params/m/v written in place."""
    n, t_dim = x2.shape
    inv_count = 1.0 / (n * t_dim)
    kernel = functools.partial(_train_step_kernel, inv_count=inv_count,
                               beta1=beta1, beta2=beta2, eps=eps)
    vmem = pltpu.MemorySpace.VMEM
    smem = pltpu.MemorySpace.SMEM
    param_struct = tuple(jax.ShapeDtypeStruct(p[k].shape, jnp.float32)
                         for k in _PKEYS)
    out_shape = (jax.ShapeDtypeStruct((1, t_dim), jnp.float32),) + param_struct * 3
    outs = pl.pallas_call(
        kernel,
        out_shape=out_shape,
        # No grid: single-shot kernel, whole arrays resident in VMEM; the two
        # bias-correction scalars ride in SMEM.
        in_specs=[pl.BlockSpec(memory_space=smem)]
                 + [pl.BlockSpec(memory_space=vmem)] * 14,
        out_specs=tuple(pl.BlockSpec(memory_space=vmem) for _ in range(13)),
        # params / m / v are updated in place (no fresh HBM allocations).
        input_output_aliases={3: 1, 4: 2, 5: 3, 6: 4,
                              7: 5, 8: 6, 9: 7, 10: 8,
                              11: 9, 12: 10, 13: 11, 14: 12},
    )(scales, x2, y2,
      p["w1t"], p["b1"], p["w2"], p["b2"],
      m["w1t"], m["b1"], m["w2"], m["b2"],
      v["w1t"], v["b1"], v["w2"], v["b2"])
    loss = outs[0][0, 0]
    new_p = dict(zip(_PKEYS, outs[1:5]))
    new_m = dict(zip(_PKEYS, outs[5:9]))
    new_v = dict(zip(_PKEYS, outs[9:13]))
    return loss, new_p, new_m, new_v


def eval_losses(packed, xs, ys):
    """Per-batch MSE losses for a stack of eval batches in one pallas_call.

    xs, ys: (n_batches, N, T).  The batch axis is the grid axis, marked
    "parallel" so both TensorCores are used on v7x (harmless on v5e/v6e).
    """
    nb, n, t_dim = xs.shape
    h_dim = packed["w1t"].shape[0]
    inv_count = 1.0 / (n * t_dim)
    kernel = functools.partial(_eval_loss_kernel, inv_count=inv_count)
    out = pl.pallas_call(
        kernel,
        out_shape=jax.ShapeDtypeStruct((nb, 1, t_dim), jnp.float32),
        grid=(nb,),
        in_specs=[
            pl.BlockSpec((1, n, t_dim), lambda i: (i, 0, 0)),
            pl.BlockSpec((1, n, t_dim), lambda i: (i, 0, 0)),
            pl.BlockSpec((h_dim, t_dim), lambda i: (0, 0)),
            pl.BlockSpec((1, h_dim), lambda i: (0, 0)),
            pl.BlockSpec((h_dim, t_dim), lambda i: (0, 0)),
            pl.BlockSpec((1, t_dim), lambda i: (0, 0)),
        ],
        out_specs=pl.BlockSpec((1, 1, t_dim), lambda i: (i, 0, 0)),
        compiler_params=pltpu.CompilerParams(dimension_semantics=("parallel",)),
    )(xs, ys, packed["w1t"], packed["b1"], packed["w2"], packed["b2"])
    return out[:, 0, 0]


# ----------------------------------------------------------------------------
# Parameter packing (lane-dense training layout) and train-state helpers
# ----------------------------------------------------------------------------
def pack_params(params):
    """Natural (w1 (T,H), b1 (H,), w2 (H,T), b2 (T,)) -> lane-dense layout.

    Fresh buffers are created so the training state can be safely donated.
    """
    return {
        "w1t": jnp.asarray(params["w1"], jnp.float32).T,
        "b1": jnp.asarray(params["b1"], jnp.float32).reshape(1, -1),
        "w2": jnp.array(params["w2"], jnp.float32),
        "b2": jnp.asarray(params["b2"], jnp.float32).reshape(1, -1),
    }


def unpack_params(packed):
    return {
        "w1": packed["w1t"].T,
        "b1": packed["b1"].reshape(-1),
        "w2": packed["w2"],
        "b2": packed["b2"].reshape(-1),
    }


def init_train_state(params):
    packed = pack_params(params)
    return {
        "params": packed,
        "m": jax.tree.map(jnp.zeros_like, packed),
        "v": jax.tree.map(jnp.zeros_like, packed),
        "t": jnp.zeros((), jnp.float32),
    }


def make_train_step(lr, beta1, beta2, eps):
    """Single fused train step (sanity check / per-batch API)."""
    def step(state, x2, y2):
        t_new = state["t"] + 1.0
        a = lr / (1.0 - beta1 ** t_new)
        c2 = 1.0 / (1.0 - beta2 ** t_new)
        scales = jnp.stack([a, c2]).astype(jnp.float32)
        loss, new_p, new_m, new_v = _fused_step_call(
            scales, x2, y2, state["params"], state["m"], state["v"],
            beta1=beta1, beta2=beta2, eps=eps)
        return loss, {"params": new_p, "m": new_m, "v": new_v, "t": t_new}
    return jax.jit(step)


def make_train_epoch(lr, beta1, beta2, eps):
    """One jitted dispatch per epoch: lax.scan of the fused train-step kernel."""
    def epoch(state, xs, ys):
        def step(carry, batch):
            x2, y2 = batch
            t_new = carry["t"] + 1.0
            a = lr / (1.0 - beta1 ** t_new)
            c2 = 1.0 / (1.0 - beta2 ** t_new)
            scales = jnp.stack([a, c2]).astype(jnp.float32)
            loss, new_p, new_m, new_v = _fused_step_call(
                scales, x2, y2, carry["params"], carry["m"], carry["v"],
                beta1=beta1, beta2=beta2, eps=eps)
            return {"params": new_p, "m": new_m, "v": new_v, "t": t_new}, loss
        return lax.scan(step, state, (xs, ys))
    # Donate the carried state so params / m / v never get fresh HBM copies.
    return jax.jit(epoch, donate_argnums=(0,))


def _stack_batches(batches):
    """List of ((B,C,T),(B,C,T)) batches -> stacked (nb, B*C, T) f32 arrays."""
    xs = jnp.stack([jnp.asarray(x, jnp.float32).reshape(-1, x.shape[-1])
                    for x, _ in batches])
    ys = jnp.stack([jnp.asarray(y, jnp.float32).reshape(-1, y.shape[-1])
                    for _, y in batches])
    return xs, ys


def model_loss(params, x, y):
    """MSE(model(x), y) for one (B, C, T) batch via the batched eval kernel."""
    t = x.shape[-1]
    xs = jnp.asarray(x, jnp.float32).reshape(1, -1, t)
    ys = jnp.asarray(y, jnp.float32).reshape(1, -1, t)
    return eval_losses(pack_params(params), xs, ys)[0]


# ----------------------------------------------------------------------------
# Pure-JAX references (correctness checks only)
# ----------------------------------------------------------------------------
def _loss_ref(params, x, y):
    n = x.shape[0] * x.shape[1]
    t = x.shape[-1]
    x2 = x.reshape(n, t).astype(jnp.float32)
    y2 = y.reshape(n, t).astype(jnp.float32)
    hh = jnp.maximum(
        jnp.dot(x2, params["w1"], precision=lax.Precision.HIGHEST) + params["b1"], 0.0)
    yhat = jnp.dot(hh, params["w2"], precision=lax.Precision.HIGHEST) + params["b2"]
    return jnp.mean((yhat - y2) ** 2)


def _ref_first_train_step(params, x, y, lr, beta1, beta2, eps):
    """Pure-JAX reference of one Adam step from zero optimizer state (t=1)."""
    loss, grads = jax.value_and_grad(_loss_ref)(params, x, y)
    new_params, m = {}, {}
    for k in params:
        g = grads[k]
        m_k = (1.0 - beta1) * g
        v_k = (1.0 - beta2) * g * g
        mhat = m_k / (1.0 - beta1)
        vhat = v_k / (1.0 - beta2)
        new_params[k] = params[k] - lr * mhat / (jnp.sqrt(vhat) + eps)
        m[k] = m_k
    return loss, new_params, m


# ----------------------------------------------------------------------------
# EarlyStopper — ported 1:1.
# ----------------------------------------------------------------------------
class EarlyStopper:
    def __init__(self, patience=1, min_delta=0):
        self.patience = patience
        self.min_delta = min_delta
        self.counter = 0
        self.min_validation_loss = float("inf")

    def early_stop(self, validation_loss):
        err = abs(validation_loss - self.min_validation_loss)
        self.min_validation_loss = validation_loss
        if err >= self.min_delta:
            self.counter = 0
        else:
            self.counter += 1
            if self.counter >= self.patience:
                return True
        return False


# ----------------------------------------------------------------------------
# Train — forward() reproduces the epoch/batch training loop semantics.
# ----------------------------------------------------------------------------
class Train:
    def __init__(self, params, epochs, alpha, output_filter, path,
                 early_stop=True, pre_trained_path="", reconstruction_loss="mse"):
        self.epochs = epochs
        self.start_epoch = 0
        self.alpha = alpha
        self.output_filter = output_filter
        self.path = path
        self.e_stop = early_stop
        self.best_valid_loss = float("inf")
        if self.e_stop:
            self.early_stopper = EarlyStopper(patience=3, min_delta=5)
        print("-" * 50)
        print("Setup Training...")
        lr = LR
        betas = (BETA1, BETA2)
        eps = EPS_ADAM
        # Training state: params in the lane-dense kernel layout + Adam moments.
        self._state = init_train_state(params)
        self._pending_update = None
        self._train_epoch = make_train_epoch(lr, betas[0], betas[1], eps)
        self._train_step = make_train_step(lr, betas[0], betas[1], eps)
        self._eval_losses = jax.jit(eval_losses)
        # TODO(synk): pre_trained_path checkpoint loading (torch.load) omitted.
        print(f"Used Device: {jax.devices()[0].platform}")
        print(f"Optimizer | lr: {lr} | betas: {betas} | eps: {eps}")
        print(f"Criterion alpha: {self.alpha}")
        print("\n")

    @property
    def params(self):
        return unpack_params(self._state["params"])

    def save_checkpoint(self, epoch, loss):
        # TODO(synk): torch.save-style checkpoint file I/O intentionally omitted.
        return None

    def forward_propagation(self, x_batch, y_batch, idx, epoch):
        # Per-batch API kept for parity with the original module; forward()
        # uses the scanned per-epoch path instead.
        t = x_batch.shape[-1]
        x2 = jnp.asarray(x_batch, jnp.float32).reshape(-1, t)
        y2 = jnp.asarray(y_batch, jnp.float32).reshape(-1, t)
        loss, new_state = self._train_step(self._state, x2, y2)
        self._pending_update = new_state
        # TODO(synk): plot_original_vs_reconstructed (PLOT path) omitted.
        return loss

    def back_propagation(self, train_loss):
        if self._pending_update is not None:
            self._state = self._pending_update
            self._pending_update = None

    def evaluate(self, x_batch, y_batch, idx, epoch):
        t = x_batch.shape[-1]
        xs = jnp.asarray(x_batch, jnp.float32).reshape(1, -1, t)
        ys = jnp.asarray(y_batch, jnp.float32).reshape(1, -1, t)
        return self._eval_losses(self._state["params"], xs, ys)[0]

    def forward(self, train_x, valid_x, test_x):
        train_total_loss, valid_total_loss = [], []
        print("-" * 50)
        print("Starting Training...")
        time_start = time.time()
        print(time_start)
        # Stack the fixed-shape batch lists once; each epoch is then a single
        # jitted lax.scan over the fused fwd+bwd+Adam kernel plus one batched
        # (grid-parallel) eval pallas_call — two dispatches per epoch instead
        # of several per batch.
        xs_tr, ys_tr = _stack_batches(train_x)
        xs_va, ys_va = _stack_batches(valid_x)
        for epoch in range(self.start_epoch, self.epochs):
            print(f"Epoch: {epoch + 1}/{self.epochs}")
            self._state, train_losses = self._train_epoch(self._state, xs_tr, ys_tr)
            valid_losses = self._eval_losses(self._state["params"], xs_va, ys_va)
            # Single host sync per epoch.
            train_losses = jax.block_until_ready(train_losses)
            valid_losses = jax.block_until_ready(valid_losses)
            avg_train_loss = float(jnp.mean(train_losses))
            avg_valid_loss = float(jnp.mean(valid_losses))
            print(f"\t Train loss = {avg_train_loss:.05}, Validation Loss = {avg_valid_loss:.05}")
            train_total_loss.append(avg_train_loss)
            valid_total_loss.append(avg_valid_loss)
            if avg_valid_loss < self.best_valid_loss:
                self.best_valid_loss = avg_valid_loss
                self.save_checkpoint(epoch + 1, avg_valid_loss)
            if self.e_stop and self.early_stopper.early_stop(avg_train_loss):
                print("Early stopping triggered.")
                break
        time_end = time.time()
        train_time = time_end - time_start
        return (train_time, train_total_loss, valid_total_loss)


# ----------------------------------------------------------------------------
# main
# ----------------------------------------------------------------------------
if __name__ == "__main__":
    key = jax.random.PRNGKey(0)
    k_w1, k_w2, k_data = jax.random.split(key, 3)

    # Deterministic parameter init (shapes implied by the per-sensor MLP model).
    params = {
        "w1": 0.02 * jax.random.normal(k_w1, (T, H), jnp.float32),
        "b1": jnp.zeros((H,), jnp.float32),
        "w2": 0.02 * jax.random.normal(k_w2, (H, T), jnp.float32),
        "b2": jnp.zeros((T,), jnp.float32),
    }

    # Small synthetic (x, y) "dataloaders": reconstruction task, y == x.
    def make_batches(key, n_batches):
        batches = []
        for _ in range(n_batches):
            key, sub = jax.random.split(key)
            x = jax.random.normal(sub, (B, C, T), jnp.float32)
            batches.append((x, x))
        return batches, key

    train_x, k_data = make_batches(k_data, 3)
    valid_x, k_data = make_batches(k_data, 2)
    test_x = []  # unused by forward(), as in the original module

    trainer = Train(params, epochs=2, alpha=0.5, output_filter=False,
                    path=".", early_stop=True)

    # ---- sanity checks: Pallas kernels vs pure-JAX references ----
    x0, y0 = train_x[0]

    # (1) forward + MSE eval kernel.
    pallas_loss = model_loss(params, x0, y0)
    ref_loss = _loss_ref(params, x0, y0)
    assert abs(float(pallas_loss) - float(ref_loss)) < 5e-3, (
        float(pallas_loss), float(ref_loss))

    # (2) fused fwd+bwd+Adam kernel: one step from a zero optimizer state.
    step_fn = make_train_step(LR, BETA1, BETA2, EPS_ADAM)
    state0 = init_train_state(params)
    x2 = x0.reshape(-1, T)
    y2 = y0.reshape(-1, T)
    loss_p, new_state = step_fn(state0, x2, y2)
    ref_loss2, ref_new_params, ref_m = _ref_first_train_step(
        params, x0, y0, LR, BETA1, BETA2, EPS_ADAM)
    assert abs(float(loss_p) - float(ref_loss2)) < 5e-3
    new_params_p = unpack_params(new_state["params"])
    for k in params:
        err = float(jnp.max(jnp.abs(new_params_p[k] - ref_new_params[k])))
        # Each per-element Adam update is bounded by lr=1e-4.
        assert err < 5e-4, (k, err)
    # First moment == (1-beta1)*grad at t=1: validates the hand-written backward
    # (transposes / reductions).  Tolerance accounts for bf16 MXU operands.
    ref_m_packed = {"w1t": ref_m["w1"].T, "b1": ref_m["b1"].reshape(1, -1),
                    "w2": ref_m["w2"], "b2": ref_m["b2"].reshape(1, -1)}
    for k in ref_m_packed:
        num = float(jnp.max(jnp.abs(new_state["m"][k] - ref_m_packed[k])))
        den = float(jnp.max(jnp.abs(ref_m_packed[k]))) + 1e-12
        assert num / den < 5e-2, (k, num / den)

    # ---- run the training-loop forward pass ----
    train_time, train_total_loss, valid_total_loss = trainer.forward(
        train_x, valid_x, test_x)
    jax.block_until_ready(trainer.params)

    print("KERNEL_OK")
</pallas_src>

<mosaic_0001>
module attributes {stable_mosaic.version = 11 : i64} {
  func.func @_eval_loss_kernel(%arg0: i32, %arg1: memref<1x32x128xf32, #tpu.memory_space<vmem>>, %arg2: memref<1x32x128xf32, #tpu.memory_space<vmem>>, %arg3: memref<32x128xf32, #tpu.memory_space<vmem>>, %arg4: memref<1x32xf32, #tpu.memory_space<vmem>>, %arg5: memref<32x128xf32, #tpu.memory_space<vmem>>, %arg6: memref<1x128xf32, #tpu.memory_space<vmem>>, %arg7: memref<1x1x128xf32, #tpu.memory_space<vmem>>) attributes {dimension_semantics = [#tpu.dimension_semantics<parallel>], iteration_bounds = array<i64: 1>, scalar_prefetch = 0 : i64, scratch_operands = 0 : i64, tpu.core_type = #tpu.core_type<tc>, window_params = [{transform_indices = @transform_0, window_bounds = array<i64: 1, 32, 128>}, {transform_indices = @transform_1, window_bounds = array<i64: 1, 32, 128>}, {pipeline_mode = #tpu.pipeline_mode<synchronous>, transform_indices = @transform_2, window_bounds = array<i64: 32, 128>}, {pipeline_mode = #tpu.pipeline_mode<synchronous>, transform_indices = @transform_3, window_bounds = array<i64: 1, 32>}, {pipeline_mode = #tpu.pipeline_mode<synchronous>, transform_indices = @transform_4, window_bounds = array<i64: 32, 128>}, {pipeline_mode = #tpu.pipeline_mode<synchronous>, transform_indices = @transform_5, window_bounds = array<i64: 1, 128>}, {transform_indices = @transform_6, window_bounds = array<i64: 1, 1, 128>}]} {
    %c0 = arith.constant 0 : index
    %c0_0 = arith.constant 0 : index
    %c0_1 = arith.constant 0 : index
    %0 = vector.load %arg1[%c0, %c0_0, %c0_1] : memref<1x32x128xf32, #tpu.memory_space<vmem>>, vector<1x32x128xf32>
    %1 = vector.shape_cast %0 : vector<1x32x128xf32> to vector<32x128xf32>
    %c0_2 = arith.constant 0 : index
    %c0_3 = arith.constant 0 : index
    %c0_4 = arith.constant 0 : index
    %2 = vector.load %arg2[%c0_2, %c0_3, %c0_4] : memref<1x32x128xf32, #tpu.memory_space<vmem>>, vector<1x32x128xf32>
    %3 = vector.shape_cast %2 : vector<1x32x128xf32> to vector<32x128xf32>
    %4 = arith.truncf %1 : vector<32x128xf32> to vector<32x128xbf16>
    %c0_5 = arith.constant 0 : index
    %c0_6 = arith.constant 0 : index
    %5 = vector.load %arg3[%c0_5, %c0_6] : memref<32x128xf32, #tpu.memory_space<vmem>>, vector<32x128xf32>
    %6 = arith.truncf %5 : vector<32x128xf32> to vector<32x128xbf16>
    %cst = arith.constant dense<0.000000e+00> : vector<32x32xf32>
    %7 = tpu.matmul %4, %6, %cst {dimension_numbers = #tpu.dot_dimension_numbers<[1], [1], [0], [0], [0, 0, 1, 0], [], []>} : vector<32x128xbf16>, vector<32x128xbf16>, vector<32x32xf32> -> vector<32x32xf32>
    %c0_7 = arith.constant 0 : index
    %c0_8 = arith.constant 0 : index
    %8 = vector.load %arg4[%c0_7, %c0_8] : memref<1x32xf32, #tpu.memory_space<vmem>>, vector<1x32xf32>
    %9 = vector.broadcast %8 : vector<1x32xf32> to vector<32x32xf32>
    %10 = arith.addf %7, %9 : vector<32x32xf32>
    %cst_9 = arith.constant 0.000000e+00 : f32
    %11 = vector.broadcast %cst_9 : f32 to vector<32x32xf32>
    %12 = arith.maximumf %10, %11 : vector<32x32xf32>
    %13 = arith.truncf %12 : vector<32x32xf32> to vector<32x32xbf16>
    %c0_10 = arith.constant 0 : index
    %c0_11 = arith.constant 0 : index
    %14 = vector.load %arg5[%c0_10, %c0_11] : memref<32x128xf32, #tpu.memory_space<vmem>>, vector<32x128xf32>
    %15 = arith.truncf %14 : vector<32x128xf32> to vector<32x128xbf16>
    %cst_12 = arith.constant dense<0.000000e+00> : vector<32x128xf32>
    %16 = tpu.matmul %13, %15, %cst_12 {dimension_numbers = #tpu.dot_dimension_numbers<[1], [0], [0], [1], [0, 0, 1, 1], [], []>} : vector<32x32xbf16>, vector<32x128xbf16>, vector<32x128xf32> -> vector<32x128xf32>
    %c0_13 = arith.constant 0 : index
    %c0_14 = arith.constant 0 : index
    %17 = vector.load %arg6[%c0_13, %c0_14] : memref<1x128xf32, #tpu.memory_space<vmem>>, vector<1x128xf32>
    %18 = vector.broadcast %17 : vector<1x128xf32> to vector<32x128xf32>
    %19 = arith.addf %16, %18 : vector<32x128xf32>
    %20 = arith.subf %19, %3 : vector<32x128xf32>
    %21 = arith.mulf %20, %20 : vector<32x128xf32>
    %22 = vector.shape_cast %21 : vector<32x128xf32> to vector<1x32x128xf32>
    %cst_15 = arith.constant dense<0.000000e+00> : vector<1xf32>
    %23 = vector.multi_reduction <add>, %22, %cst_15 [1, 2] : vector<1x32x128xf32> to vector<1xf32>
    %24 = vector.shape_cast %23 : vector<1xf32> to vector<1x1x1xf32>
    %25 = vector.extract %24[0, 0, 0] : f32 from vector<1x1x1xf32>
    %26 = vector.broadcast %25 : f32 to vector<1x1xf32>
    %cst_16 = arith.constant 2.44140625E-4 : f32
    %27 = vector.broadcast %cst_16 : f32 to vector<1x1xf32>
    %28 = arith.mulf %26, %27 : vector<1x1xf32>
    %29 = vector.shape_cast %28 : vector<1x1xf32> to vector<1x1x1xf32>
    %30 = vector.broadcast %29 : vector<1x1x1xf32> to vector<1x1x128xf32>
    %c0_17 = arith.constant 0 : index
    %c0_18 = arith.constant 0 : index
    %c0_19 = arith.constant 0 : index
    %31 = vector.load %arg7[%c0_17, %c0_18, %c0_19] : memref<1x1x128xf32, #tpu.memory_space<vmem>>, vector<1x1x128xf32>
    tpu.vector_store %arg7[%c0_17, %c0_18, %c0_19], %30 {strides = array<i32>} : memref<1x1x128xf32, #tpu.memory_space<vmem>>, vector<1x1x128xf32>,
    return
  }
  func.func @transform_0(%arg0: i32) -> (i32, i32, i32) {
    %c0_i32 = arith.constant 0 : i32
    %c0_i32_0 = arith.constant 0 : i32
    %c0_i32_1 = arith.constant 0 : i32
    return %arg0, %c0_i32, %c0_i32_0 : i32, i32, i32
  }
  func.func @transform_1(%arg0: i32) -> (i32, i32, i32) {
    %c0_i32 = arith.constant 0 : i32
    %c0_i32_0 = arith.constant 0 : i32
    %c0_i32_1 = arith.constant 0 : i32
    return %arg0, %c0_i32, %c0_i32_0 : i32, i32, i32
  }
  func.func @transform_2(%arg0: i32) -> (i32, i32) {
    %c0_i32 = arith.constant 0 : i32
    %c0_i32_0 = arith.constant 0 : i32
    %c0_i32_1 = arith.constant 0 : i32
    return %c0_i32, %c0_i32_0 : i32, i32
  }
  func.func @transform_3(%arg0: i32) -> (i32, i32) {
    %c0_i32 = arith.constant 0 : i32
    %c0_i32_0 = arith.constant 0 : i32
    %c0_i32_1 = arith.constant 0 : i32
    return %c0_i32, %c0_i32_0 : i32, i32
  }
  func.func @transform_4(%arg0: i32) -> (i32, i32) {
    %c0_i32 = arith.constant 0 : i32
    %c0_i32_0 = arith.constant 0 : i32
    %c0_i32_1 = arith.constant 0 : i32
    return %c0_i32, %c0_i32_0 : i32, i32
  }
  func.func @transform_5(%arg0: i32) -> (i32, i32) {
    %c0_i32 = arith.constant 0 : i32
    %c0_i32_0 = arith.constant 0 : i32
    %c0_i32_1 = arith.constant 0 : i32
    return %c0_i32, %c0_i32_0 : i32, i32
  }
  func.func @transform_6(%arg0: i32) -> (i32, i32, i32) {
    %c0_i32 = arith.constant 0 : i32
    %c0_i32_0 = arith.constant 0 : i32
    %c0_i32_1 = arith.constant 0 : i32
    return %arg0, %c0_i32, %c0_i32_0 : i32, i32, i32
  }
}

</mosaic_0001>

<bundles_post_ra>
// kernel: tpu_custom_call.1
= control target key start
LH: loop header
LB: loop body
LE: loop exit
PB: predicated region body
PF: predicated region fallthrough
CT: control target
= control target key end

     0   :  { %11 = vsyncpa [#allocation3], 0  ;;  %s556_s0 = inlined_call_operand.hbm [shape: f32[1,32,128], index: 0, kind: input, shape index: {}]   ;;  %s557_s1 = inlined_call_operand.hbm [shape: f32[1,32,128], index: 1, kind: input, shape index: {}]   ;;  %s558_s2 = inlined_call_operand.hbm [shape: f32[32,128], index: 2, kind: input, shape index: {}]   ;;  %s559_s3 = inlined_call_operand.vmem [shape: f32[1,32], index: 3, kind: input, shape index: {}]   ;;  %s560_s4 = inlined_call_operand.hbm [shape: f32[32,128], index: 4, kind: input, shape index: {}]   ;;  %s561_s5 = inlined_call_operand.vmem [shape: f32[1,128], index: 5, kind: input, shape index: {}]   ;;  %s562_s6 = inlined_call_operand.hbm [shape: f32[1,1,128], index: 6, kind: output, shape index: {}]  }
   0x1   :  { %12 = vsyncpa [#allocation6], 0 }
   0x2   :  { %13 = vsyncpa [#allocation9], 0 }
   0x3   :  { %14 = vsyncpa [#allocation4], 0  ;;  %s422_s21 = smov [#allocation5]   ;;  %s423_s23 = smov [#allocation2]  }
   0x4   :  { %s32_s22 = sshll.u32 %s422_s21, 4  ;;  %s20_s24 = sshll.u32 %s423_s23, 4  ;;  %s33_s22 = int_to_ptr.vmem [resolvable:$true] %s32_s22  ;;  %s464_s24 = int_to_ptr.vmem [resolvable:$true] %s20_s24 }
   0x5   :  { %s304_s27 = scalar_lea.hbm %s557_s1, 512 }
   0x6   :  { %p305_p0 = scmp.ne.s32.totalorder %s557_s1, %s304_s27  ;;  %p308_p1 = scmp.lt.u32.totalorder %s304_s27, %s557_s1 }
   0x8   :  { %p310_p2 = pnand %p308_p1, %p305_p0 }
   0xa   :  { %313 = shalt.err (!%p310_p2)
}
   0xb   :  { %s314_s8 = scalar_lea.vmem %s33_s22, 512  ;;  %p319_p4 = scmp.lt.s32.totalorder %s33_s22, %s33_s22 }
   0xc   :  { %p315_p3 = scmp.ne.s32.totalorder %s33_s22, %s314_s8  ;;  %p320_p5 = scmp.lt.s32.totalorder %s314_s8, %s314_s8 }
   0xe   :  { %p321_p6 = por %p320_p5, %p319_p4 }
  0x10   :  { %p322_p7 = pnand %p321_p6, %p315_p3 }
  0x12   :  { %325 = shalt.err (!%p322_p7)
}
  0x13   :  { %s424_s9 = smov 128   ;;  %s425_s10 = smov 8  }
  0x14   :  { %38 = dma.hbm_to_vmem [thread:$0]  %s557_s1, 512, %s33_s22, [#allocation6], %s424_s9, %s424_s9, %s425_s10  }
  0x15   :  { %s326_s15 = scalar_lea.hbm %s556_s0, 512 }
  0x16   :  { %p327_p8 = scmp.ne.s32.totalorder %s556_s0, %s326_s15  ;;  %p330_p9 = scmp.lt.u32.totalorder %s326_s15, %s556_s0 }
  0x18   :  { %p332_p10 = pnand %p330_p9, %p327_p8 }
  0x1a   :  { %335 = shalt.err (!%p332_p10)
}
  0x1b   :  { %s336_s20 = scalar_lea.vmem %s464_s24, 512  ;;  %p341_p12 = scmp.lt.s32.totalorder %s464_s24, %s464_s24 }
  0x1c   :  { %p337_p11 = scmp.ne.s32.totalorder %s464_s24, %s336_s20  ;;  %p342_p13 = scmp.lt.s32.totalorder %s336_s20, %s336_s20 }
  0x1e   :  { %p343_p0 = por %p342_p13, %p341_p12 }
  0x20   :  { %p344_p1 = pnand %p343_p0, %p337_p11 }
  0x22   :  { %347 = shalt.err (!%p344_p1)
}
  0x23   :  { %26 = dma.hbm_to_vmem [thread:$0]  %s556_s0, 512, %s464_s24, [#allocation3], %s424_s9, %s424_s9, %s425_s10  }
  0x24   :  { %s426_s22 = smov [#allocation7]   ;;  %s427_s25 = smov [#allocation8]  }
  0x25   :  { %s44_s23 = sshll.u32 %s426_s22, 4  ;;  %s58_s26 = sshll.u32 %s427_s25, 4  ;;  %s45_s23 = int_to_ptr.vmem [resolvable:$true] %s44_s23  ;;  %s501_s26 = int_to_ptr.vmem [resolvable:$true] %s58_s26 }
  0x26   :  { %s348_s29 = scalar_lea.hbm %s558_s2, 512 }
  0x27   :  { %p349_p2 = scmp.ne.s32.totalorder %s558_s2, %s348_s29  ;;  %p352_p3 = scmp.lt.u32.totalorder %s348_s29, %s558_s2 }
  0x29   :  { %p354_p4 = pnand %p352_p3, %p349_p2 }
  0x2b   :  { %357 = shalt.err (!%p354_p4)
}
  0x2c   :  { %s358_s0 = scalar_lea.vmem %s45_s23, 512  ;;  %p363_p6 = scmp.lt.s32.totalorder %s45_s23, %s45_s23 }
  0x2d   :  { %p359_p5 = scmp.ne.s32.totalorder %s45_s23, %s358_s0  ;;  %p364_p7 = scmp.lt.s32.totalorder %s358_s0, %s358_s0 }
  0x2f   :  { %p365_p8 = por %p364_p7, %p363_p6 }
  0x31   :  { %p366_p9 = pnand %p365_p8, %p359_p5 }
  0x33   :  { %369 = shalt.err (!%p366_p9)
}
  0x34   :  { %50 = dma.hbm_to_vmem [thread:$0]  %s558_s2, 512, %s45_s23, [#allocation6], %s424_s9, %s424_s9, %s425_s10  }
  0x35   :  { %s370_s15 = scalar_lea.hbm %s560_s4, 512 }
  0x36   :  { %p371_p10 = scmp.ne.s32.totalorder %s560_s4, %s370_s15  ;;  %p374_p11 = scmp.lt.u32.totalorder %s370_s15, %s560_s4 }
  0x38   :  { %p376_p12 = pnand %p374_p11, %p371_p10 }
  0x3a   :  { %379 = shalt.err (!%p376_p12)
}
  0x3b   :  { %s380_s20 = scalar_lea.vmem %s501_s26, 512  ;;  %p385_p0 = scmp.lt.s32.totalorder %s501_s26, %s501_s26 }
  0x3c   :  { %p381_p13 = scmp.ne.s32.totalorder %s501_s26, %s380_s20  ;;  %p386_p1 = scmp.lt.s32.totalorder %s380_s20, %s380_s20 }
  0x3e   :  { %p387_p2 = por %p386_p1, %p385_p0 }
  0x40   :  { %p388_p3 = pnand %p387_p2, %p381_p13 }
  0x42   :  { %391 = shalt.err (!%p388_p3)
}
  0x43   :  { %64 = dma.hbm_to_vmem [thread:$0]  %s560_s4, 512, %s501_s26, [#allocation9], %s424_s9, %s424_s9, %s425_s10  }
  0x44   :  { %414 = dma.done.wait [#allocation3], 512  }
  0x45   :  { %415 = vsyncadd [#allocation3], 4294966784 }
  0x46   :  { %416 = dma.done.wait [#allocation6], 1024  }
  0x47   :  { %417 = vsyncadd [#allocation6], 4294966272 }
  0x48   :  { %418 = dma.done.wait [#allocation9], 512  }
  0x49   :  { %419 = vsyncadd [#allocation9], 4294966784  ;;  %v90_v0 = vld [vmem:[#allocation7] sm:$0xff]  ;;  %v91_v1 = vld [vmem:[#allocation7 + $0x8] sm:$0xff]  ;;  %vm171_vm0 = vcmask 261120  }
  0x4a   :  { %v92_v2 = vld [vmem:[#allocation7 + $0x10] sm:$0xff]  ;;  %v94_v3 = vpack.c.bf16 %v91_v1, %v90_v0  ;;  %v93_v4 = vld [vmem:[#allocation7 + $0x18] sm:$0xff]  ;;  %v80_v5 = vld [vmem:[#allocation2] sm:$0xff] }
  0x4b   :  { %v81_v6 = vld [vmem:[#allocation2 + $0x8] sm:$0xff]  ;;  %v95_v7 = vpack.c.bf16 %v93_v4, %v92_v2  ;;  %v82_v9 = vld [vmem:[#allocation2 + $0x10] sm:$0xff]  ;;  %v83_v10 = vld [vmem:[#allocation2 + $0x18] sm:$0xff] }
  0x4c   :  { %v88_v8 = vpack.c.bf16 %v81_v6, %v80_v5  ;;  %279 = vmatprep.subr.bf16.mxu0 %v94_v3  ;;  %v89_v11 = vpack.c.bf16 %v83_v10, %v82_v9  ;;  %v158_v12 = vld [vmem:[#allocation8] sm:$0xff]  ;;  %v159_v13 = vld [vmem:[#allocation8 + $0x8] sm:$0xff]  ;;  %v160_v15 = vld [vmem:[#allocation8 + $0x10] sm:$0xff] }
  0x4d   :  { %280 = vmatpush3.bf16.xpose.msra.mxu0 %v94_v3  ;;  %v162_v14 = vpack.c.bf16 %v159_v13, %v158_v12  ;;  %v161_v16 = vld [vmem:[#allocation8 + $0x18] sm:$0xff]  ;;  %v267_v18 = vld [vmem:[%s559_s3] ss:$0 sm:$0xff]  ;;  %v86_v40 = vld [vmem:[#allocation5 + $0x10] sm:$0xff]  ;;  %s428_s3 = smov [#allocation10]  }
  0x4e   :  { %283 = vmatprep.mubr.bf16.mxu0 %v88_v8  ;;  %281 = vmatprep.subr.bf16.mxu0 %v95_v7  ;;  %v163_v17 = vpack.c.bf16 %v161_v16, %v160_v15  ;;  %v268_v33 = vld [vmem:[%s561_s5] ss:$0 sm:$0xff]  ;;  %v85_v41 = vld [vmem:[#allocation5 + $0x8] sm:$0xff]  ;;  %v87_v46 = vld [vmem:[#allocation5 + $0x18] sm:$0xff]  ;;  %s256_s5 = sshll.u32 %s428_s3, 4  ;;  %s257_s5 = int_to_ptr.vmem [resolvable:$true] %s256_s5 }
  0x4f   :  { %287 = vmatprep.subr.bf16.mxu1 %v162_v14  ;;  %v84_v35 = vld [vmem:[#allocation5] sm:$0xff]  ;;  %s392_s23 = scalar_lea.vmem %s257_s5, 16  ;;  %s396_s25 = scalar_lea.vmem %s257_s5, 32 }
  0x50   :  { %288 = vmatpush3.bf16.msra.mxu1 %v162_v14  ;;  %p393_p4 = scmp.ne.s32.totalorder %s257_s5, %s392_s23  ;;  %p397_p5 = scmp.lt.s32.totalorder %s257_s5, %s257_s5 }
  0x51   :  { %289 = vmatprep.subr.bf16.mxu1 %v163_v17  ;;  %p398_p6 = scmp.lt.s32.totalorder %s396_s25, %s392_s23 }
  0x53   :  { %p399_p7 = por %p398_p6, %p397_p5 }
  0x54   :  { %290 = vmatpush3.bf16.msra.mxu1 %v163_v17 }
  0x55   :  { %282 = vmatpush3.bf16.xpose.msra.mxu0 %v95_v7  ;;  %p400_p8 = pnand %p399_p7, %p393_p4 }
  0x5c   :  { %284 = vmatmul.mubr.bf16.vlgmr.msra.gmra.mrb[0].mxu0 %v89_v11 }
 0x12f   :  { %v285_v19 = vpop.f32.mrb[0].mxu0 }
 0x130   :  { %v146_v20 = vadd.f32 %v285_v19, %v267_v18  ;;  %v137_v21 = vpop.f32.mrb[1].mxu0 }
 0x131   :  { %v138_v22 = vadd.f32 %v267_v18, %v137_v21  ;;  %v286_v23 = vpop.f32.mrb[2].mxu0 }
 0x132   :  { %v149_v24 = vadd.f32 %v286_v23, %v267_v18  ;;  %v140_v25 = vpop.f32.mrb[3].mxu0  ;;  %v154_v27 = vmax.f32 %v146_v20, 0.0 }
 0x133   :  { %v141_v26 = vadd.f32 %v267_v18, %v140_v25  ;;  %v152_v29 = vmax.f32 %v138_v22, 0.0 }
 0x134   :  { %v155_v28 = vmax.f32 %v149_v24, 0.0 }
 0x135   :  { %v153_v30 = vmax.f32 %v141_v26, 0.0 }
 0x136   :  { %v157_v31 = vpack.c.bf16 %v155_v28, %v154_v27 }
 0x137   :  { %v156_v32 = vpack.c.bf16 %v153_v30, %v152_v29 }
 0x139   :  { %291 = vmatprep.mubr.msk.bf16.mxu1 %vm171_vm0, %v156_v32 }
 0x13a   :  { %292 = vmatmul.mubr.msk.bf16.vlgmr.msra.gmra.mrb[0].mxu1 %vm171_vm0, %v157_v31 }
 0x20d   :  { %v293_v34 = vpop.f32.mrb[0].mxu1 }
 0x20e   :  { %v212_v36 = vpop.f32.mrb[1].mxu1  ;;  %v221_v37 = vadd.f32 %v293_v34, %v268_v33 }
 0x20f   :  { %v213_v38 = vadd.f32 %v268_v33, %v212_v36  ;;  %v294_v39 = vpop.f32.mrb[2].mxu1 }
 0x210   :  { %v215_v42 = vpop.f32.mrb[3].mxu1  ;;  %v224_v44 = vadd.f32 %v294_v39, %v268_v33  ;;  %v229_v47 = vsub.f32 %v221_v37, %v86_v40 }
 0x211   :  { %v227_v43 = vsub.f32 %v213_v38, %v84_v35  ;;  %v216_v45 = vadd.f32 %v268_v33, %v215_v42 }
 0x212   :  { %v230_v51 = vsub.f32 %v224_v44, %v87_v46  ;;  %v233_v52 = vmul.f32 %v229_v47, %v229_v47 }
 0x213   :  { %v228_v48 = vsub.f32 %v216_v45, %v85_v41  ;;  %v231_v49 = vmul.f32 %v227_v43, %v227_v43 }
 0x214   :  { %v234_v54 = vmul.f32 %v230_v51, %v230_v51 }
 0x215   :  { %v232_v50 = vmul.f32 %v228_v48, %v228_v48 }
 0x217   :  { %v235_v53 = vadd.f32 %v232_v50, %v231_v49 }
 0x219   :  { %v236_v55 = vadd.f32 %v235_v53, %v233_v52 }
 0x21b   :  { %v237_v56 = vadd.f32 %v236_v55, %v234_v54 }
 0x21d   :  { %238 = vadd.xlane.f32.xlu0 %v237_v56 }
 0x2aa   :  { %v239_v57 = vpop.xlane.xlu0 %238 }
 0x2ab   :  { %v240_v58 = vrot.slane %v239_v57, 4 }
 0x2ad   :  { %v241_v59 = vadd.f32 %v240_v58, %v239_v57 }
 0x2af   :  { %v242_v60 = vrot.slane %v241_v59, 2 }
 0x2b1   :  { %v243_v61 = vadd.f32 %v242_v60, %v241_v59 }
 0x2b3   :  { %v244_v62 = vrot.slane %v243_v61, 1 }
 0x2b5   :  { %v245_v63 = vadd.f32 %v244_v62, %v243_v61 }
 0x2b7   :  { %295 = vpush %v245_v63 }
 0x2e8   :  { %s296_s22 = spop %295 }
 0x2e9   :  { %v247_v0 = vstv %s296_s22 }
 0x2ea   :  { %v248_v1 = vmul.f32 0.00024414063, %v247_v0 }
 0x2ec   :  { %249 = vst [vmem:[#allocation10] sm:$0x1] %v248_v1 }
 0x2ed   :  { %403 = shalt.err (!%p400_p8)
}
 0x2ee   :  { %s404_s28 = scalar_lea.hbm %s562_s6, 16 }
 0x2ef   :  { %p405_p9 = scmp.ne.s32.totalorder %s562_s6, %s404_s28  ;;  %p408_p10 = scmp.lt.u32.totalorder %s404_s28, %s562_s6 }
 0x2f1   :  { %p410_p11 = pnand %p408_p10, %p405_p9 }
 0x2f3   :  { %413 = shalt.err (!%p410_p11)
}
 0x2f4   :  { %259 = dma.vmem_to_hbm [thread:$0]  %s257_s5, 16, %s562_s6, [#allocation4]  }
 0x2f5   :  { %420 = dma.done.wait [#allocation4], 16  }
 0x2f6   :  { %421 = vsyncadd [#allocation4], 4294967280 }
 0x2f7   :  { %263 = vsyncpa [#allocation3], 1 }
 0x2f8   :  { %264 = vsyncpa [#allocation6], 1 }
 0x2f9   :  { %265 = vsyncpa [#allocation9], 1 }
 0x2fa   :  { %266 = vsyncpa [#allocation4], 1 }

</bundles_post_ra>
